<compile_context>
chip_gen: v7x
topology: tpu7x:2x2x1
jax: 0.10.0
libtpu: 0.0.40
codegen_flags: <defaults>
</compile_context>

<pallas_src>
import functools

import jax
import jax.numpy as jnp
from jax.experimental import pallas as pl
from jax.experimental.pallas import tpu as pltpu


def _wmse_kernel(ch_ref, xpred_ref, seqlen_ref, out_ref, acc_ref, *,
                 eps, nc, approx_recip):
    # ch_ref:     (2, tb, tt)  two needed channels, channel-major
    # xpred_ref:  (tb, tt)
    # seqlen_ref: (tb, 1) f32
    # out_ref:    (tb, 1) f32   (resident across the T axis)
    # acc_ref:    (tb, 1) f32 VMEM scratch accumulator
    t = pl.program_id(1)

    @pl.when(t == 0)
    def _():
        acc_ref[...] = jnp.zeros_like(acc_ref)

    xp = xpred_ref[...].astype(jnp.float32)
    a = ch_ref[0].astype(jnp.float32)
    b = ch_ref[1].astype(jnp.float32)

    if nc == 3:
        # a = x[:, :, 1] (target), b = x[:, :, 2] (scale / mask channel)
        mask = (b != 0.0).astype(jnp.float32)
        if approx_recip:
            diff = (xp - a) * pl.reciprocal(b + eps, approx=True)
        else:
            diff = (xp - a) / (b + eps)
    else:
        # a = x[:, :, 0] (mask channel), b = x[:, :, 1] (target)
        mask = (a != 0.0).astype(jnp.float32)
        diff = xp - b

    acc_ref[...] += jnp.sum(diff * diff * mask, axis=-1, keepdims=True)

    @pl.when(t == pl.num_programs(1) - 1)
    def _():
        out_ref[...] = (acc_ref[...] / seqlen_ref[...]).astype(out_ref.dtype)


def _round_up(v, m):
    return ((v + m - 1) // m) * m


def wmse_loss(x, x_pred, seq_len, *, eps=1e-10, nc=3, approx_recip=False,
              block_b=64, block_t=2048):
    """Pallas implementation of WMSELoss.forward.

    x:       (B, T, C)  (any float dtype; math done in f32 in-kernel)
    x_pred:  (B, T)
    seq_len: scalar or (B,)
    returns: (B,) float32 per-sample weighted MSE
    """
    x = jnp.asarray(x)
    x_pred = jnp.asarray(x_pred)
    B, T, _ = x.shape
    assert x_pred.shape == (B, T)

    # Single wrapper pass: pick the two channels the loss needs and lay them
    # out channel-major so the kernel sees lane-dense (tb, tt) tiles.
    lo = 1 if nc == 3 else 0
    x2c = jnp.transpose(x[:, :, lo:lo + 2], (2, 0, 1))  # (2, B, T)

    seq_len = jnp.broadcast_to(jnp.asarray(seq_len, jnp.float32), (B,))
    seq_len = seq_len.reshape(B, 1)

    # Tile sizes: lane axis (T) large (>=512 when possible, multiple of 128),
    # sublane axis (B) multiple of 8. Pad so the grid divides evenly; padded
    # region has mask == 0 so it contributes nothing to the sum.
    Bp = _round_up(B, 8)
    Tp = _round_up(T, 128)
    tb = min(Bp, _round_up(block_b, 8))
    tt = min(Tp, _round_up(block_t, 128))
    Bp = _round_up(Bp, tb)
    Tp = _round_up(Tp, tt)

    if (Bp, Tp) != (B, T):
        x2c = jnp.pad(x2c, ((0, 0), (0, Bp - B), (0, Tp - T)))
        x_pred = jnp.pad(x_pred, ((0, Bp - B), (0, Tp - T)))
        seq_len = jnp.pad(seq_len, ((0, Bp - B), (0, 0)), constant_values=1.0)

    grid = (Bp // tb, Tp // tt)

    kernel = functools.partial(_wmse_kernel, eps=eps, nc=nc,
                               approx_recip=approx_recip)

    out = pl.pallas_call(
        kernel,
        out_shape=jax.ShapeDtypeStruct((Bp, 1), jnp.float32),
        grid_spec=pltpu.PrefetchScalarGridSpec(
            num_scalar_prefetch=0,
            grid=grid,
            in_specs=[
                pl.BlockSpec((2, tb, tt), lambda i, t: (0, i, t)),
                pl.BlockSpec((tb, tt), lambda i, t: (i, t)),
                pl.BlockSpec((tb, 1), lambda i, t: (i, 0)),
            ],
            out_specs=pl.BlockSpec((tb, 1), lambda i, t: (i, 0)),
            scratch_shapes=[pltpu.VMEM((tb, 1), jnp.float32)],
        ),
        compiler_params=pltpu.CompilerParams(
            dimension_semantics=("parallel", "arbitrary"),
            vmem_limit_bytes=32 * 1024 * 1024,
        ),
    )(x2c, x_pred, seq_len)

    return out[:B, 0]


def _reference_wmse(x, x_pred, seq_len, eps=1e-10, nc=3):
    x = jnp.asarray(x, jnp.float32)
    x_pred = jnp.asarray(x_pred, jnp.float32)
    if nc == 3:
        mask = (x[:, :, 2] != 0).astype(jnp.float32)
        return jnp.sum(((x_pred - x[:, :, 1]) / (x[:, :, 2] + eps)) ** 2 * mask,
                       axis=-1) / seq_len
    mask = (x[:, :, 0] != 0).astype(jnp.float32)
    return jnp.sum((x_pred - x[:, :, 1]) ** 2 * mask, axis=-1) / seq_len


if __name__ == "__main__":
    key = jax.random.PRNGKey(0)
    k1, k2, k3 = jax.random.split(key, 3)

    B, T, C = 2, 8, 3
    x = jax.random.normal(k1, (B, T, C), dtype=jnp.float32)
    # Zero out some entries of the scale/mask channels so the mask is exercised.
    zero_mask = jax.random.bernoulli(k3, p=0.3, shape=(B, T))
    x = x.at[:, :, 2].set(jnp.where(zero_mask, 0.0, x[:, :, 2]))
    x = x.at[:, :, 0].set(jnp.where(zero_mask, 0.0, x[:, :, 0]))

    x_pred = jax.random.normal(k2, (B, T), dtype=jnp.float32)
    seq_len = jnp.array([float(T), float(T)], dtype=jnp.float32)

    # nc = 3 path
    out3 = jax.block_until_ready(wmse_loss(x, x_pred, seq_len, eps=1e-10, nc=3))
    ref3 = _reference_wmse(x, x_pred, seq_len, eps=1e-10, nc=3)
    assert out3.shape == (B,)
    assert jnp.allclose(out3, ref3, rtol=1e-5, atol=1e-5), (out3, ref3)

    # nc = 2 path
    out2 = jax.block_until_ready(wmse_loss(x, x_pred, seq_len, eps=1e-10, nc=2))
    ref2 = _reference_wmse(x, x_pred, seq_len, eps=1e-10, nc=2)
    assert out2.shape == (B,)
    assert jnp.allclose(out2, ref2, rtol=1e-5, atol=1e-5), (out2, ref2)

    print("KERNEL_OK")
</pallas_src>

<mosaic_0001>
module attributes {stable_mosaic.version = 11 : i64} {
  func.func @_wmse_kernel(%arg0: i32, %arg1: i32, %arg2: memref<2x8x128xf32, #tpu.memory_space<vmem>>, %arg3: memref<8x128xf32, #tpu.memory_space<vmem>>, %arg4: memref<8x1xf32, #tpu.memory_space<vmem>>, %arg5: memref<8x1xf32, #tpu.memory_space<vmem>>, %arg6: memref<8x1xf32, #tpu.memory_space<vmem>>) attributes {dimension_semantics = [#tpu.dimension_semantics<parallel>, #tpu.dimension_semantics<arbitrary>], iteration_bounds = array<i64: 1, 1>, scalar_prefetch = 0 : i64, scratch_operands = 1 : i64, tpu.core_type = #tpu.core_type<tc>, window_params = [{transform_indices = @transform_0, window_bounds = array<i64: 2, 8, 128>}, {transform_indices = @transform_1, window_bounds = array<i64: 8, 128>}, {transform_indices = @transform_2, window_bounds = array<i64: 8, 1>}, {transform_indices = @transform_3, window_bounds = array<i64: 8, 1>}]} {
    %c0_i32 = arith.constant 0 : i32
    %0 = arith.cmpi eq, %arg1, %c0_i32 : i32
    %1 = arith.extui %0 : i1 to i32
    %c0_i32_0 = arith.constant 0 : i32
    %2 = arith.cmpi ne, %1, %c0_i32_0 : i32
    scf.if %2 {
      %cst_15 = arith.constant 0.000000e+00 : f32
      %26 = vector.broadcast %cst_15 : f32 to vector<8x1xf32>
      %c0_16 = arith.constant 0 : index
      %c0_17 = arith.constant 0 : index
      %27 = vector.load %arg6[%c0_16, %c0_17] : memref<8x1xf32, #tpu.memory_space<vmem>>, vector<8x1xf32>
      tpu.vector_store %arg6[%c0_16, %c0_17], %26 {strides = array<i32>} : memref<8x1xf32, #tpu.memory_space<vmem>>, vector<8x1xf32>,
    } else {
    }
    %c0 = arith.constant 0 : index
    %c0_1 = arith.constant 0 : index
    %3 = vector.load %arg3[%c0, %c0_1] : memref<8x128xf32, #tpu.memory_space<vmem>>, vector<8x128xf32>
    %c0_2 = arith.constant 0 : index
    %c0_3 = arith.constant 0 : index
    %c0_4 = arith.constant 0 : index
    %4 = vector.load %arg2[%c0_2, %c0_3, %c0_4] : memref<2x8x128xf32, #tpu.memory_space<vmem>>, vector<1x8x128xf32>
    %5 = vector.shape_cast %4 : vector<1x8x128xf32> to vector<8x128xf32>
    %c1 = arith.constant 1 : index
    %c0_5 = arith.constant 0 : index
    %c0_6 = arith.constant 0 : index
    %6 = vector.load %arg2[%c1, %c0_5, %c0_6] : memref<2x8x128xf32, #tpu.memory_space<vmem>>, vector<1x8x128xf32>
    %7 = vector.shape_cast %6 : vector<1x8x128xf32> to vector<8x128xf32>
    %cst = arith.constant 0.000000e+00 : f32
    %8 = vector.broadcast %cst : f32 to vector<8x128xf32>
    %9 = arith.cmpf one, %7, %8 : vector<8x128xf32>
    %10 = arith.extui %9 : vector<8x128xi1> to vector<8x128xi32>
    %11 = arith.sitofp %10 : vector<8x128xi32> to vector<8x128xf32>
    %12 = arith.subf %3, %5 : vector<8x128xf32>
    %cst_7 = arith.constant 1.000000e-10 : f32
    %13 = vector.broadcast %cst_7 : f32 to vector<8x128xf32>
    %14 = arith.addf %7, %13 : vector<8x128xf32>
    %15 = arith.divf %12, %14 : vector<8x128xf32>
    %c0_8 = arith.constant 0 : index
    %c0_9 = arith.constant 0 : index
    %16 = vector.load %arg6[%c0_8, %c0_9] : memref<8x1xf32, #tpu.memory_space<vmem>>, vector<8x1xf32>
    %17 = arith.mulf %15, %15 : vector<8x128xf32>
    %18 = arith.mulf %17, %11 : vector<8x128xf32>
    %cst_10 = arith.constant dense<0.000000e+00> : vector<8xf32>
    %19 = vector.multi_reduction <add>, %18, %cst_10 [1] : vector<8x128xf32> to vector<8xf32>
    %20 = vector.shape_cast %19 : vector<8xf32> to vector<8x1xf32>
    %21 = arith.addf %16, %20 : vector<8x1xf32>
    %c0_11 = arith.constant 0 : index
    %c0_12 = arith.constant 0 : index
    %22 = vector.load %arg6[%c0_11, %c0_12] : memref<8x1xf32, #tpu.memory_space<vmem>>, vector<8x1xf32>
    tpu.vector_store %arg6[%c0_11, %c0_12], %21 {strides = array<i32>} : memref<8x1xf32, #tpu.memory_space<vmem>>, vector<8x1xf32>,
    %c0_i32_13 = arith.constant 0 : i32
    %23 = arith.cmpi eq, %arg1, %c0_i32_13 : i32
    %24 = arith.extui %23 : i1 to i32
    %c0_i32_14 = arith.constant 0 : i32
    %25 = arith.cmpi ne, %24, %c0_i32_14 : i32
    scf.if %25 {
      %c0_15 = arith.constant 0 : index
      %c0_16 = arith.constant 0 : index
      %26 = vector.load %arg6[%c0_15, %c0_16] : memref<8x1xf32, #tpu.memory_space<vmem>>, vector<8x1xf32>
      %c0_17 = arith.constant 0 : index
      %c0_18 = arith.constant 0 : index
      %27 = vector.load %arg4[%c0_17, %c0_18] : memref<8x1xf32, #tpu.memory_space<vmem>>, vector<8x1xf32>
      %28 = arith.divf %26, %27 : vector<8x1xf32>
      %c0_19 = arith.constant 0 : index
      %c0_20 = arith.constant 0 : index
      %29 = vector.load %arg5[%c0_19, %c0_20] : memref<8x1xf32, #tpu.memory_space<vmem>>, vector<8x1xf32>
      tpu.vector_store %arg5[%c0_19, %c0_20], %28 {strides = array<i32>} : memref<8x1xf32, #tpu.memory_space<vmem>>, vector<8x1xf32>,
    } else {
    }
    return
  }
  func.func @transform_0(%arg0: i32, %arg1: i32) -> (i32, i32, i32) {
    %c0_i32 = arith.constant 0 : i32
    %c0_i32_0 = arith.constant 0 : i32
    return %c0_i32, %arg0, %arg1 : i32, i32, i32
  }
  func.func @transform_1(%arg0: i32, %arg1: i32) -> (i32, i32) {
    %c0_i32 = arith.constant 0 : i32
    return %arg0, %arg1 : i32, i32
  }
  func.func @transform_2(%arg0: i32, %arg1: i32) -> (i32, i32) {
    %c0_i32 = arith.constant 0 : i32
    %c0_i32_0 = arith.constant 0 : i32
    return %arg0, %c0_i32 : i32, i32
  }
  func.func @transform_3(%arg0: i32, %arg1: i32) -> (i32, i32) {
    %c0_i32 = arith.constant 0 : i32
    %c0_i32_0 = arith.constant 0 : i32
    return %arg0, %c0_i32 : i32, i32
  }
}

</mosaic_0001>

<bundles_post_ra>
// kernel: tpu_custom_call.1
= control target key start
LH: loop header
LB: loop body
LE: loop exit
PB: predicated region body
PF: predicated region fallthrough
CT: control target
= control target key end

     0   :  { %8 = vsyncpa [#allocation4], 0  ;;  %s99_s12 = smov [#allocation3]   ;;  %s147_s0 = inlined_call_operand.hbm [shape: f32[2,8,128], index: 0, kind: input, shape index: {}]   ;;  %s148_s1 = inlined_call_operand.vmem [shape: f32[8,128], index: 1, kind: input, shape index: {}]   ;;  %s149_s2 = inlined_call_operand.vmem [shape: f32[8,1], index: 2, kind: input, shape index: {}]   ;;  %s150_s3 = inlined_call_operand.vmem [shape: f32[8,1], index: 3, kind: output, shape index: {}]  }
   0x1   :  { %s14_s13 = sshll.u32 %s99_s12, 4  ;;  %s75_s16 = scalar_lea.hbm %s147_s0, 256  ;;  %s15_s13 = int_to_ptr.vmem [resolvable:$true] %s14_s13 }
   0x2   :  { %p76_p0 = scmp.ne.s32.totalorder %s147_s0, %s75_s16  ;;  %p79_p1 = scmp.lt.u32.totalorder %s75_s16, %s147_s0 }
   0x4   :  { %p81_p2 = pnand %p79_p1, %p76_p0 }
   0x6   :  { %84 = shalt.err (!%p81_p2)
}
   0x7   :  { %s85_s21 = scalar_lea.vmem %s15_s13, 256  ;;  %p90_p4 = scmp.lt.s32.totalorder %s15_s13, %s15_s13 }
   0x8   :  { %p86_p3 = scmp.ne.s32.totalorder %s15_s13, %s85_s21  ;;  %p91_p5 = scmp.lt.s32.totalorder %s85_s21, %s85_s21 }
   0xa   :  { %p92_p6 = por %p91_p5, %p90_p4 }
   0xc   :  { %p93_p7 = pnand %p92_p6, %p86_p3 }
   0xe   :  { %96 = shalt.err (!%p93_p7)
}
   0xf   :  { %s100_s22 = smov 128   ;;  %s101_s23 = smov 8  }
  0x10   :  { %20 = dma.hbm_to_vmem [thread:$0]  %s147_s0, 256, %s15_s13, [#allocation4], %s100_s22, %s100_s22, %s101_s23  }
  0x11   :  { %97 = dma.done.wait [#allocation4], 256  }
  0x12   :  { %98 = vsyncadd [#allocation4], 4294967040  ;;  %vm32_vm0 = vcmask 7168   ;;  %v102_v0 = vmov 0.0   ;;  %v37_v1 = vld [vmem:[#allocation3 + $0x8] sm:$0xff]  ;;  %v34_v3 = vld [vmem:[%s148_s1] sm:$0xff] }
  0x13   :  { %33 = vst.msk [vmem:[#allocation2] sm:$0xff] %vm32_vm0, %v102_v0  ;;  %v42_v2 = vadd.f32 1e-10, %v37_v1  ;;  %v35_v4 = vld [vmem:[#allocation3] sm:$0xff]  ;;  %vm38_vm1 = vcmp.ne.f32.partialorder %v37_v1, 0.0  ;;  %v57_v11 = vld [vmem:[%s149_s2] sm:$0xff] }
  0x14   :  { %v41_v5 = vsub.f32 %v34_v3, %v35_v4  ;;  %v66_v8 = vsel %vm38_vm1, 1.0, %v102_v0 }
  0x15   :  { %71 = vrcp.f32 %v42_v2 }
  0x16   :  { %73 = vrcp.f32 %v57_v11 }
  0x1a   :  { %v45_v12 = vld [vmem:[#allocation2] sm:$0xff] }
  0x1f   :  { %v72_v6 = vpop.eup %71 }
  0x20   :  { %v44_v7 = vmul.f32 %v72_v6, %v41_v5  ;;  %v74_v15 = vpop.eup %73 }
  0x22   :  { %v46_v9 = vmul.f32 %v44_v7, %v44_v7 }
  0x24   :  { %v47_v10 = vmul.f32 %v66_v8, %v46_v9 }
  0x26   :  { %48 = vadd.xlane.f32.xlu0 %v47_v10 }
  0xb3   :  { %v49_v13 = vpop.xlane.xlu0 %48 }
  0xb4   :  { %v50_v14 = vadd.f32 %v49_v13, %v45_v12 }
  0xb6   :  { %52 = vst.msk [vmem:[#allocation2] sm:$0xff] %vm32_vm0, %v50_v14 }
  0xbd   :  { %v56_v16 = vld [vmem:[#allocation2] sm:$0xff] }
  0xbe   :  { %v59_v17 = vmul.f32 %v74_v15, %v56_v16 }
  0xc0   :  { %60 = vst.msk [vmem:[%s150_s3] sm:$0xff] %vm32_vm0, %v59_v17 }
  0xc1   :  { %65 = vsyncpa [#allocation4], 1 }

</bundles_post_ra>
